<compile_context>
chip_gen: v6e
topology: v6e:2x2x1
jax: 0.10.0
libtpu: 0.0.40
codegen_flags: <defaults>
</compile_context>

<pallas_src>
import jax
import jax.numpy as jnp
from jax.experimental import pallas as pl
from jax.experimental.pallas import tpu as pltpu


def _round_up(x, m):
    return (x + m - 1) // m * m


def conv1x1_bn_relu_kernel(x_ref, w_ref, shift_ref, o_ref):
    # x_ref:     (Cin, TP)   input channels x pixel tile (pixels on lanes)
    # w_ref:     (Cout, Cin) conv weight with BN scale folded in
    # shift_ref: (Cout, 1)   (conv_bias - running_mean) * scale + beta
    # o_ref:     (Cout, TP)
    acc = jnp.dot(w_ref[...], x_ref[...], preferred_element_type=jnp.float32)
    y = acc + shift_ref[...]
    o_ref[...] = jnp.maximum(y, 0.0).astype(o_ref.dtype)


def _pick_tile_p(p, cin, cout, in_bytes, out_bytes,
                 vmem_budget=40 << 20, max_tile=2048):
    """Largest pixel tile (multiple of 128) fitting the VMEM budget.

    Budget: double-buffered activation tile + double-buffered output tile +
    resident weight/shift + headroom, in element bytes.
    """
    cap = min(max_tile, _round_up(p, 128))
    tile = 128
    for cand in (2048, 1024, 512, 256, 128):
        usage = (2 * cin * cand * in_bytes        # activation (2 buffers)
                 + 2 * cout * cand * out_bytes    # output (2 buffers)
                 + cout * cin * in_bytes          # weight (single-buffered)
                 + cout * 4                       # shift
                 + (1 << 20))                     # compiler scratch headroom
        if usage <= vmem_budget:
            tile = cand
            break
    return min(tile, cap)


def conv1x1_bn_relu(x_nchw, weight, bias, gamma, beta, running_mean,
                    running_var, eps=1e-5, compute_dtype=jnp.bfloat16,
                    tile_p=None):
    """Fused 1x1 conv + BatchNorm2d(eval) + ReLU.

    x_nchw: (N, Cin, H, W); weight: (Cout, Cin, 1, 1); others: (Cout,).
    """
    n, cin, h, w = x_nchw.shape
    cout = weight.shape[0]
    p = h * w
    out_dtype = x_nchw.dtype

    # Fold BN (eval mode) + conv bias:  BN(Wx + b) = (scale*W) x + shift.
    scale = gamma / jnp.sqrt(running_var + eps)                       # (Cout,)
    shift = ((bias - running_mean) * scale + beta).astype(jnp.float32)
    w_folded = (weight.reshape(cout, cin) * scale[:, None]).astype(compute_dtype)
    shift2d = shift.reshape(cout, 1)

    # NCHW -> (N, Cin, P): pure reshape, no transpose / no extra HBM pass.
    x3d = x_nchw.reshape(n, cin, p).astype(compute_dtype)

    in_bytes = jnp.dtype(compute_dtype).itemsize
    out_bytes = jnp.dtype(out_dtype).itemsize
    if tile_p is None:
        tile_p = _pick_tile_p(p, cin, cout, in_bytes, out_bytes)
    tile_p = max(128, _round_up(min(tile_p, _round_up(p, 128)), 128))

    # Pad the pixel axis to a tile multiple (padded pixels are sliced off
    # afterwards; a 1x1 conv has no cross-pixel interaction).
    p_pad = _round_up(p, tile_p)
    if p_pad != p:
        x3d = jnp.pad(x3d, ((0, 0), (0, 0), (0, p_pad - p)))

    grid = (n, p_pad // tile_p)

    cost = pl.CostEstimate(
        flops=int(2 * n * p * cin * cout),
        transcendentals=0,
        bytes_accessed=int(n * p * cin * in_bytes
                           + n * p * cout * out_bytes
                           + cout * cin * in_bytes + cout * 4),
    )

    def run(min_buffer_constants):
        const_kwargs = {}
        if min_buffer_constants:
            # Weight / shift never change across the grid: single-buffer them
            # to recover VMEM (default is double-buffering every input).
            const_kwargs = dict(pipeline_mode=pl.Buffered(1))
        in_specs = [
            pl.BlockSpec((None, cin, tile_p), lambda b, pi: (b, 0, pi)),
            pl.BlockSpec((cout, cin), lambda b, pi: (0, 0), **const_kwargs),
            pl.BlockSpec((cout, 1), lambda b, pi: (0, 0), **const_kwargs),
        ]
        out_specs = pl.BlockSpec((None, cout, tile_p), lambda b, pi: (b, 0, pi))
        return pl.pallas_call(
            conv1x1_bn_relu_kernel,
            out_shape=jax.ShapeDtypeStruct((n, cout, p_pad), out_dtype),
            grid_spec=pltpu.PrefetchScalarGridSpec(
                num_scalar_prefetch=0,
                grid=grid,
                in_specs=in_specs,
                out_specs=out_specs,
            ),
            compiler_params=pltpu.CompilerParams(
                dimension_semantics=("parallel", "parallel"),
                # Above the 32 MiB scoped default, below v7x's 64 MiB physical
                # (and well below v5e/v6e's 128 MiB).
                vmem_limit_bytes=48 << 20,
            ),
            cost_estimate=cost,
        )(x3d, w_folded, shift2d)

    try:
        out3d = run(min_buffer_constants=True)
    except Exception:  # fallback if pipeline_mode=pl.Buffered(1) is unsupported
        out3d = run(min_buffer_constants=False)

    if p_pad != p:
        out3d = out3d[:, :, :p]
    return out3d.reshape(n, cout, h, w)


if __name__ == "__main__":
    key = jax.random.PRNGKey(0)
    k_x, k_w, k_b, k_g, k_be, k_m, k_v = jax.random.split(key, 7)

    N, Cin, Cout, H, W = 2, 4, 8, 16, 16
    eps = 1e-5

    x = jax.random.normal(k_x, (N, Cin, H, W), dtype=jnp.float32)
    weight = jax.random.normal(k_w, (Cout, Cin, 1, 1), dtype=jnp.float32) * 0.1
    bias = jax.random.normal(k_b, (Cout,), dtype=jnp.float32) * 0.1
    gamma = 1.0 + 0.1 * jax.random.normal(k_g, (Cout,), dtype=jnp.float32)
    beta = 0.1 * jax.random.normal(k_be, (Cout,), dtype=jnp.float32)
    running_mean = 0.1 * jax.random.normal(k_m, (Cout,), dtype=jnp.float32)
    running_var = jnp.abs(1.0 + 0.1 * jax.random.normal(k_v, (Cout,),
                                                        dtype=jnp.float32))

    out = conv1x1_bn_relu(x, weight, bias, gamma, beta,
                          running_mean, running_var, eps=eps)
    out = jax.block_until_ready(out)
    assert out.shape == (N, Cout, H, W)

    # Reference 1: identical folded + bf16 math (tight tolerance).
    scale_r = gamma / jnp.sqrt(running_var + eps)
    shift_r = (bias - running_mean) * scale_r + beta
    w_fold_r = (weight.reshape(Cout, Cin) * scale_r[:, None]).astype(jnp.bfloat16)
    x_b = x.reshape(N, Cin, H * W).astype(jnp.bfloat16)
    ref1 = jnp.einsum('oc,ncp->nop', w_fold_r, x_b,
                      preferred_element_type=jnp.float32)
    ref1 = jnp.maximum(ref1 + shift_r[:, None], 0.0).reshape(N, Cout, H, W)
    assert jnp.allclose(out, ref1, atol=1e-4, rtol=1e-4), \
        float(jnp.max(jnp.abs(out - ref1)))

    # Reference 2: full-precision conv + BN(eval) + ReLU (PyTorch semantics);
    # loose tolerance accounts for the bf16 matmul operands.
    conv = jnp.einsum('nchw,oc->nohw', x, weight.reshape(Cout, Cin)) \
        + bias.reshape(1, Cout, 1, 1)
    bn = (conv - running_mean.reshape(1, Cout, 1, 1)) / \
        jnp.sqrt(running_var.reshape(1, Cout, 1, 1) + eps) * \
        gamma.reshape(1, Cout, 1, 1) + beta.reshape(1, Cout, 1, 1)
    ref2 = jnp.maximum(bn, 0.0)
    assert jnp.allclose(out, ref2, atol=5e-2, rtol=5e-2), \
        float(jnp.max(jnp.abs(out - ref2)))

    print("KERNEL_OK")
</pallas_src>

<mosaic_0001>
module attributes {stable_mosaic.version = 11 : i64} {
  func.func @conv1x1_bn_relu_kernel(%arg0: i32, %arg1: i32, %arg2: memref<1x4x256xbf16, #tpu.memory_space<vmem>>, %arg3: memref<8x4xbf16, #tpu.memory_space<vmem>>, %arg4: memref<8x1xf32, #tpu.memory_space<vmem>>, %arg5: memref<1x8x256xf32, #tpu.memory_space<vmem>>) attributes {dimension_semantics = [#tpu.dimension_semantics<parallel>, #tpu.dimension_semantics<parallel>], iteration_bounds = array<i64: 2, 1>, scalar_prefetch = 0 : i64, scratch_operands = 0 : i64, tpu.core_type = #tpu.core_type<tc>, window_params = [{transform_indices = @transform_0, window_bounds = array<i64: 1, 4, 256>}, {pipeline_mode = #tpu.pipeline_mode<synchronous>, transform_indices = @transform_1, window_bounds = array<i64: 8, 4>}, {pipeline_mode = #tpu.pipeline_mode<synchronous>, transform_indices = @transform_2, window_bounds = array<i64: 8, 1>}, {transform_indices = @transform_3, window_bounds = array<i64: 1, 8, 256>}]} {
    %c0 = arith.constant 0 : index
    %c0_0 = arith.constant 0 : index
    %0 = vector.load %arg3[%c0, %c0_0] : memref<8x4xbf16, #tpu.memory_space<vmem>>, vector<8x4xbf16>
    %c0_1 = arith.constant 0 : index
    %c0_2 = arith.constant 0 : index
    %c0_3 = arith.constant 0 : index
    %1 = vector.load %arg2[%c0_1, %c0_2, %c0_3] : memref<1x4x256xbf16, #tpu.memory_space<vmem>>, vector<1x4x256xbf16>
    %2 = vector.shape_cast %1 : vector<1x4x256xbf16> to vector<4x256xbf16>
    %cst = arith.constant dense<0.000000e+00> : vector<8x256xf32>
    %3 = tpu.matmul %0, %2, %cst {dimension_numbers = #tpu.dot_dimension_numbers<[1], [0], [0], [1], [0, 0, 1, 1], [], []>} : vector<8x4xbf16>, vector<4x256xbf16>, vector<8x256xf32> -> vector<8x256xf32>
    %c0_4 = arith.constant 0 : index
    %c0_5 = arith.constant 0 : index
    %4 = vector.load %arg4[%c0_4, %c0_5] : memref<8x1xf32, #tpu.memory_space<vmem>>, vector<8x1xf32>
    %5 = vector.broadcast %4 : vector<8x1xf32> to vector<8x256xf32>
    %6 = arith.addf %3, %5 : vector<8x256xf32>
    %cst_6 = arith.constant 0.000000e+00 : f32
    %7 = vector.broadcast %cst_6 : f32 to vector<8x256xf32>
    %8 = arith.maximumf %6, %7 : vector<8x256xf32>
    %c0_7 = arith.constant 0 : index
    %c0_8 = arith.constant 0 : index
    %c0_9 = arith.constant 0 : index
    %9 = vector.load %arg5[%c0_7, %c0_8, %c0_9] : memref<1x8x256xf32, #tpu.memory_space<vmem>>, vector<1x8x256xf32>
    %10 = vector.shape_cast %9 : vector<1x8x256xf32> to vector<8x256xf32>
    %11 = vector.shape_cast %8 : vector<8x256xf32> to vector<1x8x256xf32>
    tpu.vector_store %arg5[%c0_7, %c0_8, %c0_9], %11 {strides = array<i32>} : memref<1x8x256xf32, #tpu.memory_space<vmem>>, vector<1x8x256xf32>,
    return
  }
  func.func @transform_0(%arg0: i32, %arg1: i32) -> (i32, i32, i32) {
    %c0_i32 = arith.constant 0 : i32
    %c0_i32_0 = arith.constant 0 : i32
    return %arg0, %c0_i32, %arg1 : i32, i32, i32
  }
  func.func @transform_1(%arg0: i32, %arg1: i32) -> (i32, i32) {
    %c0_i32 = arith.constant 0 : i32
    %c0_i32_0 = arith.constant 0 : i32
    %c0_i32_1 = arith.constant 0 : i32
    return %c0_i32, %c0_i32_0 : i32, i32
  }
  func.func @transform_2(%arg0: i32, %arg1: i32) -> (i32, i32) {
    %c0_i32 = arith.constant 0 : i32
    %c0_i32_0 = arith.constant 0 : i32
    %c0_i32_1 = arith.constant 0 : i32
    return %c0_i32, %c0_i32_0 : i32, i32
  }
  func.func @transform_3(%arg0: i32, %arg1: i32) -> (i32, i32, i32) {
    %c0_i32 = arith.constant 0 : i32
    %c0_i32_0 = arith.constant 0 : i32
    return %arg0, %c0_i32, %arg1 : i32, i32, i32
  }
}

module attributes {stable_mosaic.version = 11 : i64} {
  func.func @conv1x1_bn_relu_kernel(%arg0: i32, %arg1: i32, %arg2: memref<1x4x256xbf16, #tpu.memory_space<vmem>>, %arg3: memref<8x4xbf16, #tpu.memory_space<vmem>>, %arg4: memref<8x1xf32, #tpu.memory_space<vmem>>, %arg5: memref<1x8x256xf32, #tpu.memory_space<vmem>>) attributes {dimension_semantics = [#tpu.dimension_semantics<parallel>, #tpu.dimension_semantics<parallel>], iteration_bounds = array<i64: 2, 1>, scalar_prefetch = 0 : i64, scratch_operands = 0 : i64, tpu.core_type = #tpu.core_type<tc>, window_params = [{transform_indices = @transform_0, window_bounds = array<i64: 1, 4, 256>}, {pipeline_mode = #tpu.pipeline_mode<synchronous>, transform_indices = @transform_1, window_bounds = array<i64: 8, 4>}, {pipeline_mode = #tpu.pipeline_mode<synchronous>, transform_indices = @transform_2, window_bounds = array<i64: 8, 1>}, {transform_indices = @transform_3, window_bounds = array<i64: 1, 8, 256>}]} {
    %c0 = arith.constant 0 : index
    %c0_0 = arith.constant 0 : index
    %0 = vector.load %arg3[%c0, %c0_0] : memref<8x4xbf16, #tpu.memory_space<vmem>>, vector<8x4xbf16>
    %c0_1 = arith.constant 0 : index
    %c0_2 = arith.constant 0 : index
    %c0_3 = arith.constant 0 : index
    %1 = vector.load %arg2[%c0_1, %c0_2, %c0_3] : memref<1x4x256xbf16, #tpu.memory_space<vmem>>, vector<1x4x256xbf16>
    %2 = vector.shape_cast %1 : vector<1x4x256xbf16> to vector<4x256xbf16>
    %cst = arith.constant dense<0.000000e+00> : vector<8x256xf32>
    %3 = tpu.matmul %0, %2, %cst {dimension_numbers = #tpu.dot_dimension_numbers<[1], [0], [0], [1], [0, 0, 1, 1], [], []>} : vector<8x4xbf16>, vector<4x256xbf16>, vector<8x256xf32> -> vector<8x256xf32>
    %c0_4 = arith.constant 0 : index
    %c0_5 = arith.constant 0 : index
    %4 = vector.load %arg4[%c0_4, %c0_5] : memref<8x1xf32, #tpu.memory_space<vmem>>, vector<8x1xf32>
    %5 = vector.broadcast %4 : vector<8x1xf32> to vector<8x256xf32>
    %6 = arith.addf %3, %5 : vector<8x256xf32>
    %cst_6 = arith.constant 0.000000e+00 : f32
    %7 = vector.broadcast %cst_6 : f32 to vector<8x256xf32>
    %8 = arith.maximumf %6, %7 : vector<8x256xf32>
    %c0_7 = arith.constant 0 : index
    %c0_8 = arith.constant 0 : index
    %c0_9 = arith.constant 0 : index
    %9 = vector.load %arg5[%c0_7, %c0_8, %c0_9] : memref<1x8x256xf32, #tpu.memory_space<vmem>>, vector<1x8x256xf32>
    %10 = vector.shape_cast %9 : vector<1x8x256xf32> to vector<8x256xf32>
    %11 = vector.shape_cast %8 : vector<8x256xf32> to vector<1x8x256xf32>
    tpu.vector_store %arg5[%c0_7, %c0_8, %c0_9], %11 {strides = array<i32>} : memref<1x8x256xf32, #tpu.memory_space<vmem>>, vector<1x8x256xf32>,
    return
  }
  func.func @transform_0(%arg0: i32, %arg1: i32) -> (i32, i32, i32) {
    %c0_i32 = arith.constant 0 : i32
    %c0_i32_0 = arith.constant 0 : i32
    return %arg0, %c0_i32, %arg1 : i32, i32, i32
  }
  func.func @transform_1(%arg0: i32, %arg1: i32) -> (i32, i32) {
    %c0_i32 = arith.constant 0 : i32
    %c0_i32_0 = arith.constant 0 : i32
    %c0_i32_1 = arith.constant 0 : i32
    return %c0_i32, %c0_i32_0 : i32, i32
  }
  func.func @transform_2(%arg0: i32, %arg1: i32) -> (i32, i32) {
    %c0_i32 = arith.constant 0 : i32
    %c0_i32_0 = arith.constant 0 : i32
    %c0_i32_1 = arith.constant 0 : i32
    return %c0_i32, %c0_i32_0 : i32, i32
  }
  func.func @transform_3(%arg0: i32, %arg1: i32) -> (i32, i32, i32) {
    %c0_i32 = arith.constant 0 : i32
    %c0_i32_0 = arith.constant 0 : i32
    return %arg0, %c0_i32, %arg1 : i32, i32, i32
  }
}

</mosaic_0001>

<bundles_post_ra>
// kernel: tpu_custom_call.1
= control target key start
LH: loop header
LB: loop body
LE: loop exit
PB: predicated region body
PF: predicated region fallthrough
CT: control target
= control target key end

     0   :  { %8 = vsyncpa [#allocation3], 0  ;;  %s653_s0 = inlined_call_operand.vmem [shape: bf16[2,4,256], index: 0, kind: input, shape index: {}]   ;;  %s654_s1 = inlined_call_operand.vmem [shape: bf16[8,4], index: 1, kind: input, shape index: {}]   ;;  %s655_s2 = inlined_call_operand.vmem [shape: f32[8,1], index: 2, kind: input, shape index: {}]   ;;  %s656_s3 = inlined_call_operand.hbm [shape: f32[2,8,256], index: 3, kind: output, shape index: {}]  }
   0x1   :  { %10 = vsyncpa [#allocation3 + $0x1], 0  ;;  %s542_s12 = smov 0   ;;  %s544_s13 = smov 0  }
   0x2   :  { %s546_s14 = smov 0   ;;  %s548_s15 = smov 0  }
   0x3   :  { %s550_s16 = smov 0   ;;  %s552_s17 = smov 0  }
   0x4 LB: > { %s367_s18 = sadd.s32 4294967295, %s518_s17   ;;  %s368_s19 = sadd.s32 4294967294, %s518_s17   ;;  %s518_s17 = sphi %s552_s17, %s16_s17   ;;  %s514_s16 = sphi %s550_s16, %s663_s16   ;;  %s510_s15 = sphi %s548_s15, %s662_s15   ;;  %s506_s14 = sphi %s546_s14, %s661_s14   ;;  %s502_s13 = sphi %s544_s13, %s660_s13   ;;  %s498_s12 = sphi %s542_s12, %s659_s12  }
   0x5   : > { %s28_s20 = sadd.s32 1, %s514_s16  ;;  %s107_s21 = sadd.s32 1, %s506_s14 }
   0x6   : > { %p30_p0 = scmp.ge.s32.totalorder %s28_s20, 2  ;;  %p117_p1 = scmp.ne.s32.totalorder %s506_s14, %s502_s13 }
   0x7   : > { %p118_p2 = scmp.eq.s32.totalorder %s367_s18, 1  ;;  %p123_p3 = scmp.ne.s32.totalorder %s502_s13, %s498_s12 }
   0x8   : > { %s665_s20 = smov (%p30_p0, %s28_s20), 0  ;;  %p124_p5 = scmp.eq.s32.totalorder %s368_s19, 1 }
   0x9   : > { %p582_p4 = por %p118_p2, %p117_p1  ;;  %s102_s23 = ssub.s32 %s514_s16, %s665_s20 }
   0xa   : > { %p371_p6 = scmp.ge.s32.totalorder %s518_s17, 1  ;;  %p105_p7 = scmp.eq.s32.totalorder %s102_s23, 0 }
   0xb   : > { %p589_p8 = por %p124_p5, %p123_p3  ;;  %p161_p9 = scmp.lt.s32.totalorder %s518_s17, 3 }
   0xc   : > { %s595_s25 = scalar_select %p105_p7, %s506_s14, %s107_s21  }
   0xd   : > { %p162_p10 = pnand %p371_p6, %p161_p9 }
   0xe   : > { %p190_p11 = scmp.lt.s32.totalorder (!%p162_p10), %s510_s15, 1  ;;  %s186_s8 = sand.u32 (!%p162_p10), 1, %s502_s13  }
   0xf   : > { %165 = sbr.rel (%p162_p10) target bundleno = 243 (0xf3), region = 32  ;;  %s372_s9 = sshll.u32 (!%p162_p10), %s186_s8, 4 }
  0x10   : > { %s384_s10 = sshll.u32 (!%p162_p10), %s510_s15, 8  ;;  %s188_s11 = scalar_lea.vmem (!%p162_p10), [#allocation2], %s372_s9 }
  0x11   : > { %s291_s18 = sshll.u32 (!%p162_p10), %s188_s11, 4  ;;  %s613_s23 = scalar_lea.hbm (!%p162_p10), %s656_s3, %s384_s10  ;;  %s292_s18 = int_to_ptr.vmem [resolvable:$true] %s291_s18 }
  0x12   : > { %s275_s26 = scalar_lea.sflag (!%p162_p10), [#allocation3], %s186_s8  ;;  %s442_s27 = scalar_lea.vmem (!%p162_p10), %s292_s18, 256 }
  0x13   : > { %p443_p12 = scmp.ne.s32.totalorder (!%p162_p10), %s292_s18, %s442_s27 }
  0x14   : > { %v520_v0 = vmov 0   ;;  %v203_v1 = vld [vmem:[%s655_s2] sm:$0xff]  ;;  %s191_s28 = scalar_select %p190_p11, %s510_s15, 1  ;;  %vm222_vm0 = vcmask 1041408   ;;  %vm218_vm1 = vcmask 31744  }
  0x15   : > { %261 = vmatprep.mubr.bf16.mxu0 %v520_v0  ;;  %441 = vset.pattern.permute.xlu0 %v520_v0  ;;  %v201_v5 = vld [vmem:[%s654_s1] sm:$0xf]  ;;  %p444_p13 = pnand %p443_p12, %p582_p4  ;;  %s521_s15 = smov [#allocation2]  }
  0x16   : > { %206 = vperm.xlu0 %441, %v203_v1   ;;  %s383_s29 = sshll.u32 %s191_s28, 2  ;;  %s446_s28 = sshll.u32 %s521_s15, 4  ;;  %s447_s28 = int_to_ptr.vmem [resolvable:$false] %s446_s28 }
  0x17   : > { %s197_s5 = scalar_lea.vmem %s653_s0, %s383_s29  ;;  %p445_p0 = pneg %p444_p13 }
  0x18   : > { %v375_v2 = vld.sshfl [vmem:[%s197_s5] sm:$0x33 pattern:$0x76325410]  ;;  %s448_s29 = scalar_lea.vmem %s447_s28, 512  ;;  %p449_p1 = scmp.lt.s32.totalorder %s292_s18, %s447_s28 }
  0x19   : > { %v217_v3 = vcombine.high %v375_v2, %v375_v2  ;;  %v224_v4 = vsel %vm222_vm0, %v375_v2, 0  ;;  %p450_p2 = scmp.lt.s32.totalorder %s448_s29, %s442_s27 }
  0x1b   : > { %376 = vmatprep.subr.msk.bf16.mxu0 %vm222_vm0, %v217_v3  ;;  %p451_p3 = por %p450_p2, %p449_p1 }
  0x1c   : > { %244 = vmatpush1.bf16.msra.mxu0 %v224_v4 }
  0x1d   : > { %p452_p5 = pnand %p451_p3, %p445_p0 }
  0x1f   : > { %377 = vmatmul.mubr.msk.bf16.vlgmr.msra.gmra.mxu0 %vm218_vm1, %v201_v5 }
  0x91   : > { %v207_v6 = vpop.permute.xlu0 %206 }
  0xdf   : > { %v263_v7 = vpop.f32.mrf.mxu0 }
  0xe0   : > { %v264_v8 = vadd.f32 %v263_v7, %v207_v6 }
  0xe1   : > { %v265_v9 = vpop.f32.mrf.mxu0 }
  0xe2   : > { %v270_v10 = vmax.f32 %v264_v8, 0.0  ;;  %v266_v11 = vadd.f32 %v265_v9, %v207_v6 }
  0xe3   : > { %v267_v12 = vpop.f32.mrf.mxu0 }
  0xe4   : > { %272 = vst [vmem:[%s188_s11] sm:$0xff] %v270_v10  ;;  %v271_v13 = vmax.f32 %v266_v11, 0.0 }
  0xe5   : > { %v268_v14 = vpop.f32.mrf.mxu0 }
  0xe6   : > { %273 = vst [vmem:[%s188_s11 + $0x8] sm:$0xff] %v271_v13 }
  0xe7   : > { %455 = shalt.err (!%p452_p5)
}
  0xe8   : > { %s456_s30 = scalar_lea.hbm %s613_s23, 256  ;;  %s460_s6 = scalar_lea.hbm %s656_s3, 512 }
  0xe9   : > { %p457_p6 = scmp.ne.s32.totalorder %s613_s23, %s456_s30  ;;  %p461_p10 = scmp.lt.s32.totalorder %s613_s23, %s656_s3 }
  0xea   : > { %p462_p11 = scmp.lt.s32.totalorder %s460_s6, %s456_s30 }
  0xeb   : > { %p458_p7 = pnand %p457_p6, %p582_p4 }
  0xec   : > { %p463_p12 = por %p462_p11, %p461_p10 }
  0xed   : > { %p459_p9 = pneg %p458_p7 }
  0xef   : > { %p464_p13 = pnand %p463_p12, %p459_p9 }
  0xf1   : > { %467 = shalt.err (!%p464_p13)
}
  0xf2   : > { %385 = dma.vmem_to_hbm [thread:$0]  (%p582_p4), %s292_s18, 256, %s613_s23, %s275_s26  }
  0xf3 PF: > { %p391_p0 = scmp.ge.s32.totalorder %s518_s17, 2  ;;  %s303_s9 = sand.u32 1, %s498_s12  }
  0xf4   : > { %s304_s10 = scalar_lea.sflag [#allocation3], %s303_s9 }
  0xf5   : > { %p388_p1 = pnand %p391_p0, %p589_p8 }
  0xf7   : > { %p389_p2 = pneg %p388_p1 }
  0xf9   : > { %493 = dma.done.wait (%p389_p2), %s304_s10, 256  }
  0xfa   : > { %495 = vsyncadd (%p389_p2), %s304_s10, 4294967040  ;;  %s16_s17 = sadd.s32 1, %s518_s17   ;;  %s659_s12 = smov %s502_s13 }
  0xfb   : > { %p13_p3 = scmp.ge.s32.totalorder %s16_s17, 4   ;;  %s660_s13 = smov %s506_s14 }
  0xfc   : > { %s661_s14 = smov %s595_s25  ;;  %s662_s15 = smov %s514_s16 }
  0xfd   : > { %s663_s16 = smov %s665_s20  ;;  %15 = sbr.rel (!%p13_p3) target bundleno = 4 (0x4), region = 67 }
 0x102   :  { %309 = vsyncpa [#allocation3], 1 }
 0x103   :  { %311 = vsyncpa [#allocation3 + $0x1], 1 }

// kernel: tpu_custom_call.1
= control target key start
LH: loop header
LB: loop body
LE: loop exit
PB: predicated region body
PF: predicated region fallthrough
CT: control target
= control target key end

     0   :  { %8 = vsyncpa [#allocation3], 0  ;;  %s653_s0 = inlined_call_operand.vmem [shape: bf16[2,4,256], index: 0, kind: input, shape index: {}]   ;;  %s654_s1 = inlined_call_operand.vmem [shape: bf16[8,4], index: 1, kind: input, shape index: {}]   ;;  %s655_s2 = inlined_call_operand.vmem [shape: f32[8,1], index: 2, kind: input, shape index: {}]   ;;  %s656_s3 = inlined_call_operand.hbm [shape: f32[2,8,256], index: 3, kind: output, shape index: {}]  }
   0x1   :  { %10 = vsyncpa [#allocation3 + $0x1], 0  ;;  %s542_s12 = smov 0   ;;  %s544_s13 = smov 0  }
   0x2   :  { %s546_s14 = smov 0   ;;  %s548_s15 = smov 0  }
   0x3   :  { %s550_s16 = smov 0   ;;  %s552_s17 = smov 0  }
   0x4 LB: > { %s367_s18 = sadd.s32 4294967295, %s518_s17   ;;  %s368_s19 = sadd.s32 4294967294, %s518_s17   ;;  %s518_s17 = sphi %s552_s17, %s16_s17   ;;  %s514_s16 = sphi %s550_s16, %s663_s16   ;;  %s510_s15 = sphi %s548_s15, %s662_s15   ;;  %s506_s14 = sphi %s546_s14, %s661_s14   ;;  %s502_s13 = sphi %s544_s13, %s660_s13   ;;  %s498_s12 = sphi %s542_s12, %s659_s12  }
   0x5   : > { %s28_s20 = sadd.s32 1, %s514_s16  ;;  %s107_s21 = sadd.s32 1, %s506_s14 }
   0x6   : > { %p30_p0 = scmp.ge.s32.totalorder %s28_s20, 2  ;;  %p117_p1 = scmp.ne.s32.totalorder %s506_s14, %s502_s13 }
   0x7   : > { %p118_p2 = scmp.eq.s32.totalorder %s367_s18, 1  ;;  %p123_p3 = scmp.ne.s32.totalorder %s502_s13, %s498_s12 }
   0x8   : > { %s665_s20 = smov (%p30_p0, %s28_s20), 0  ;;  %p124_p5 = scmp.eq.s32.totalorder %s368_s19, 1 }
   0x9   : > { %p582_p4 = por %p118_p2, %p117_p1  ;;  %s102_s23 = ssub.s32 %s514_s16, %s665_s20 }
   0xa   : > { %p371_p6 = scmp.ge.s32.totalorder %s518_s17, 1  ;;  %p105_p7 = scmp.eq.s32.totalorder %s102_s23, 0 }
   0xb   : > { %p589_p8 = por %p124_p5, %p123_p3  ;;  %p161_p9 = scmp.lt.s32.totalorder %s518_s17, 3 }
   0xc   : > { %s595_s25 = scalar_select %p105_p7, %s506_s14, %s107_s21  }
   0xd   : > { %p162_p10 = pnand %p371_p6, %p161_p9 }
   0xe   : > { %p190_p11 = scmp.lt.s32.totalorder (!%p162_p10), %s510_s15, 1  ;;  %s186_s8 = sand.u32 (!%p162_p10), 1, %s502_s13  }
   0xf   : > { %165 = sbr.rel (%p162_p10) target bundleno = 243 (0xf3), region = 32  ;;  %s372_s9 = sshll.u32 (!%p162_p10), %s186_s8, 4 }
  0x10   : > { %s384_s10 = sshll.u32 (!%p162_p10), %s510_s15, 8  ;;  %s188_s11 = scalar_lea.vmem (!%p162_p10), [#allocation2], %s372_s9 }
  0x11   : > { %s291_s18 = sshll.u32 (!%p162_p10), %s188_s11, 4  ;;  %s613_s23 = scalar_lea.hbm (!%p162_p10), %s656_s3, %s384_s10  ;;  %s292_s18 = int_to_ptr.vmem [resolvable:$true] %s291_s18 }
  0x12   : > { %s275_s26 = scalar_lea.sflag (!%p162_p10), [#allocation3], %s186_s8  ;;  %s442_s27 = scalar_lea.vmem (!%p162_p10), %s292_s18, 256 }
  0x13   : > { %p443_p12 = scmp.ne.s32.totalorder (!%p162_p10), %s292_s18, %s442_s27 }
  0x14   : > { %v520_v0 = vmov 0   ;;  %v203_v1 = vld [vmem:[%s655_s2] sm:$0xff]  ;;  %s191_s28 = scalar_select %p190_p11, %s510_s15, 1  ;;  %vm222_vm0 = vcmask 1041408   ;;  %vm218_vm1 = vcmask 31744  }
  0x15   : > { %261 = vmatprep.mubr.bf16.mxu0 %v520_v0  ;;  %441 = vset.pattern.permute.xlu0 %v520_v0  ;;  %v201_v5 = vld [vmem:[%s654_s1] sm:$0xf]  ;;  %p444_p13 = pnand %p443_p12, %p582_p4  ;;  %s521_s15 = smov [#allocation2]  }
  0x16   : > { %206 = vperm.xlu0 %441, %v203_v1   ;;  %s383_s29 = sshll.u32 %s191_s28, 2  ;;  %s446_s28 = sshll.u32 %s521_s15, 4  ;;  %s447_s28 = int_to_ptr.vmem [resolvable:$false] %s446_s28 }
  0x17   : > { %s197_s5 = scalar_lea.vmem %s653_s0, %s383_s29  ;;  %p445_p0 = pneg %p444_p13 }
  0x18   : > { %v375_v2 = vld.sshfl [vmem:[%s197_s5] sm:$0x33 pattern:$0x76325410]  ;;  %s448_s29 = scalar_lea.vmem %s447_s28, 512  ;;  %p449_p1 = scmp.lt.s32.totalorder %s292_s18, %s447_s28 }
  0x19   : > { %v217_v3 = vcombine.high %v375_v2, %v375_v2  ;;  %v224_v4 = vsel %vm222_vm0, %v375_v2, 0  ;;  %p450_p2 = scmp.lt.s32.totalorder %s448_s29, %s442_s27 }
  0x1b   : > { %376 = vmatprep.subr.msk.bf16.mxu0 %vm222_vm0, %v217_v3  ;;  %p451_p3 = por %p450_p2, %p449_p1 }
  0x1c   : > { %244 = vmatpush1.bf16.msra.mxu0 %v224_v4 }
  0x1d   : > { %p452_p5 = pnand %p451_p3, %p445_p0 }
  0x1f   : > { %377 = vmatmul.mubr.msk.bf16.vlgmr.msra.gmra.mxu0 %vm218_vm1, %v201_v5 }
  0x91   : > { %v207_v6 = vpop.permute.xlu0 %206 }
  0xdf   : > { %v263_v7 = vpop.f32.mrf.mxu0 }
  0xe0   : > { %v264_v8 = vadd.f32 %v263_v7, %v207_v6 }
  0xe1   : > { %v265_v9 = vpop.f32.mrf.mxu0 }
  0xe2   : > { %v270_v10 = vmax.f32 %v264_v8, 0.0  ;;  %v266_v11 = vadd.f32 %v265_v9, %v207_v6 }
  0xe3   : > { %v267_v12 = vpop.f32.mrf.mxu0 }
  0xe4   : > { %272 = vst [vmem:[%s188_s11] sm:$0xff] %v270_v10  ;;  %v271_v13 = vmax.f32 %v266_v11, 0.0 }
  0xe5   : > { %v268_v14 = vpop.f32.mrf.mxu0 }
  0xe6   : > { %273 = vst [vmem:[%s188_s11 + $0x8] sm:$0xff] %v271_v13 }
  0xe7   : > { %455 = shalt.err (!%p452_p5)
}
  0xe8   : > { %s456_s30 = scalar_lea.hbm %s613_s23, 256  ;;  %s460_s6 = scalar_lea.hbm %s656_s3, 512 }
  0xe9   : > { %p457_p6 = scmp.ne.s32.totalorder %s613_s23, %s456_s30  ;;  %p461_p10 = scmp.lt.s32.totalorder %s613_s23, %s656_s3 }
  0xea   : > { %p462_p11 = scmp.lt.s32.totalorder %s460_s6, %s456_s30 }
  0xeb   : > { %p458_p7 = pnand %p457_p6, %p582_p4 }
  0xec   : > { %p463_p12 = por %p462_p11, %p461_p10 }
  0xed   : > { %p459_p9 = pneg %p458_p7 }
  0xef   : > { %p464_p13 = pnand %p463_p12, %p459_p9 }
  0xf1   : > { %467 = shalt.err (!%p464_p13)
}
  0xf2   : > { %385 = dma.vmem_to_hbm [thread:$0]  (%p582_p4), %s292_s18, 256, %s613_s23, %s275_s26  }
  0xf3 PF: > { %p391_p0 = scmp.ge.s32.totalorder %s518_s17, 2  ;;  %s303_s9 = sand.u32 1, %s498_s12  }
  0xf4   : > { %s304_s10 = scalar_lea.sflag [#allocation3], %s303_s9 }
  0xf5   : > { %p388_p1 = pnand %p391_p0, %p589_p8 }
  0xf7   : > { %p389_p2 = pneg %p388_p1 }
  0xf9   : > { %493 = dma.done.wait (%p389_p2), %s304_s10, 256  }
  0xfa   : > { %495 = vsyncadd (%p389_p2), %s304_s10, 4294967040  ;;  %s16_s17 = sadd.s32 1, %s518_s17   ;;  %s659_s12 = smov %s502_s13 }
  0xfb   : > { %p13_p3 = scmp.ge.s32.totalorder %s16_s17, 4   ;;  %s660_s13 = smov %s506_s14 }
  0xfc   : > { %s661_s14 = smov %s595_s25  ;;  %s662_s15 = smov %s514_s16 }
  0xfd   : > { %s663_s16 = smov %s665_s20  ;;  %15 = sbr.rel (!%p13_p3) target bundleno = 4 (0x4), region = 67 }
 0x102   :  { %309 = vsyncpa [#allocation3], 1 }
 0x103   :  { %311 = vsyncpa [#allocation3 + $0x1], 1 }

</bundles_post_ra>
